<compile_context>
chip_gen: v7x
topology: tpu7x:2x2x1
jax: 0.10.0
libtpu: 0.0.40
codegen_flags: <defaults>
</compile_context>

<pallas_src>
import functools

import numpy as np
import jax
import jax.numpy as jnp
from jax.experimental import pallas as pl
from jax.experimental.pallas import tpu as pltpu


# ----------------------------------------------------------------------------
# Hardware-aware budgets & tile selection
# ----------------------------------------------------------------------------
def _round_up(x, m):
    return (x + m - 1) // m * m


def _sublane_pack(dtype):
    """Sublane packing factor: 8 for f32, 16 for bf16, 32 for int8/fp8."""
    itemsize = jnp.dtype(dtype).itemsize
    return max(8, 32 // max(1, itemsize))


def _tpu_budgets():
    """Return (vmem_limit_bytes, block_cap_bytes), generation-aware."""
    vmem_cap = 128 * 1024 * 1024
    try:
        info = pltpu.get_tpu_info()
        vmem_cap = int(getattr(info, "vmem_capacity_bytes", vmem_cap))
    except Exception:
        pass
    if vmem_cap <= 64 * 1024 * 1024:
        # v7x: 64 MiB VMEM per TensorCore — smaller blocks, keep headroom.
        return 40 * 1024 * 1024, 2 * 1024 * 1024
    # v5e / v6e: 128 MiB physical VMEM (scoped default is only 16/32 MiB,
    # so the explicit raise matters).
    return 48 * 1024 * 1024, 4 * 1024 * 1024


def _cf_tiles(n, c, s, dtype):
    """Pick (TB, TS, vmem_limit) for a (N, C, S) channel-axis LayerNorm."""
    vmem_limit, block_cap = _tpu_budgets()
    pack = _sublane_pack(dtype)
    c_pad = _round_up(max(c, 1), pack)                 # sublane padding of C
    # Conservative per-spatial-element footprint (f32 working temporaries).
    per_s = c_pad * max(jnp.dtype(dtype).itemsize, 4)
    cap_s = max(128, block_cap // per_s)

    if s <= cap_s:
        ts = s                                         # full spatial axis (legal block dim)
        tb = max(1, min(n, cap_s // max(s, 1)))        # grow over batch
        if n >= 2:
            tb = min(tb, pl.cdiv(n, 2))                # >= 2 batch blocks (megacore)
        elif s >= 256:
            ts = min(s, _round_up(pl.cdiv(s, 2), 128))  # n == 1: split spatial instead
    else:
        tb = 1
        ts = max(128, (cap_s // 128) * 128)            # 128-aligned lane-dense tile
    return tb, ts, vmem_limit


def _cl_tiles(m, c, dtype):
    """Pick (TM, vmem_limit) for row-wise (M, C) LayerNorm."""
    vmem_limit, block_cap = _tpu_budgets()
    pack = _sublane_pack(dtype)
    c_pad = _round_up(max(c, 1), 128)                  # lane padding of C
    per_row = c_pad * max(jnp.dtype(dtype).itemsize, 4)
    cap_rows = max(pack, block_cap // per_row)

    if m <= pack:
        return m, vmem_limit
    tm = min(cap_rows, m)
    if m >= 2 * pack:
        tm = min(tm, pl.cdiv(m, 2))                    # >= 2 blocks (megacore)
    tm = max(pack, (tm // pack) * pack)                # sublane-pack aligned (>= 8)
    return tm, vmem_limit


# ----------------------------------------------------------------------------
# Kernels (two-pass statistics: mean, then sum((x-mean)^2))
# ----------------------------------------------------------------------------
def _ln_cf_kernel(x_ref, g_ref, b_ref, o_ref, *, eps, inv_c):
    """Normalize over axis 1 of a (TB, C, TS) block.  C on sublanes, TS on lanes."""
    x = x_ref[...].astype(jnp.float32)                      # (TB, C, TS)
    mean = jnp.sum(x, axis=1, keepdims=True) * inv_c        # (TB, 1, TS)
    d = x - mean
    var = jnp.sum(d * d, axis=1, keepdims=True) * inv_c     # (TB, 1, TS)
    inv = jax.lax.rsqrt(var + eps)
    y = d * inv * g_ref[...] + b_ref[...]                   # g/b: (C, 1) broadcast
    o_ref[...] = y.astype(o_ref.dtype)


def _ln_cl_kernel(x_ref, g_ref, b_ref, o_ref, *, eps, inv_c):
    """Normalize over the last dim of a (TM, C) block (F.layer_norm semantics)."""
    x = x_ref[...].astype(jnp.float32)                      # (TM, C)
    mean = jnp.sum(x, axis=-1, keepdims=True) * inv_c       # (TM, 1)
    d = x - mean
    var = jnp.sum(d * d, axis=-1, keepdims=True) * inv_c
    inv = jax.lax.rsqrt(var + eps)
    y = d * inv * g_ref[...] + b_ref[...]                   # g/b: (1, C)
    o_ref[...] = y.astype(o_ref.dtype)


# ----------------------------------------------------------------------------
# pallas_call wrappers
# ----------------------------------------------------------------------------
def _ln_over_axis1(xr, weight, bias, eps):
    """LayerNorm over axis 1 of a (N, C, S) array.  Lane-dense (S on lanes)."""
    n, c, s = (int(d) for d in xr.shape)
    tb, ts, vmem_limit = _cf_tiles(n, c, s, xr.dtype)
    grid = (pl.cdiv(n, tb), pl.cdiv(s, ts))

    return pl.pallas_call(
        functools.partial(_ln_cf_kernel, eps=float(eps), inv_c=1.0 / c),
        out_shape=jax.ShapeDtypeStruct((n, c, s), xr.dtype),
        grid=grid,
        in_specs=[
            pl.BlockSpec((tb, c, ts), lambda i, j: (i, 0, j)),
            pl.BlockSpec((c, 1), lambda i, j: (0, 0)),
            pl.BlockSpec((c, 1), lambda i, j: (0, 0)),
        ],
        out_specs=pl.BlockSpec((tb, c, ts), lambda i, j: (i, 0, j)),
        compiler_params=pltpu.CompilerParams(
            dimension_semantics=("parallel", "parallel"),
            vmem_limit_bytes=vmem_limit,
        ),
    )(
        xr,
        weight.reshape(c, 1).astype(jnp.float32),
        bias.reshape(c, 1).astype(jnp.float32),
    )


def layer_norm_channels_first(x, weight, bias, eps=1e-6):
    """x: (N, C, *spatial); normalize over C per spatial location (ConvNeXt)."""
    orig_shape = x.shape
    n, c = int(orig_shape[0]), int(orig_shape[1])
    s = int(np.prod(orig_shape[2:])) if len(orig_shape) > 2 else 1
    xr = x.reshape(n, c, s)                     # free reshape (contiguous)
    out = _ln_over_axis1(xr, weight, bias, eps)
    return out.reshape(orig_shape)


def layer_norm_channels_last(x, weight, bias, eps=1e-6):
    """x: (..., C); normalize over the last dim (F.layer_norm semantics)."""
    orig_shape = x.shape
    c = int(orig_shape[-1])
    m = int(np.prod(orig_shape[:-1])) if len(orig_shape) > 1 else 1

    if c % 128 != 0 and c <= 96:
        # Small, lane-sparse C: route through a lane-dense transposed layout.
        # Costs one extra HBM transpose pass each way but the kernel's loads and
        # stores are full-width (no masked partial vst).
        xt = jnp.transpose(x.reshape(m, c))                       # (C, M)
        yt = _ln_over_axis1(xt.reshape(1, c, m), weight, bias, eps)
        return jnp.transpose(yt.reshape(c, m)).reshape(orig_shape)

    # Direct row-wise kernel: lane-dense whenever C % 128 == 0 (typical hidden
    # sizes); moderate masked-store waste otherwise.
    xr = x.reshape(m, c)
    tm, vmem_limit = _cl_tiles(m, c, x.dtype)
    grid = (pl.cdiv(m, tm),)

    out = pl.pallas_call(
        functools.partial(_ln_cl_kernel, eps=float(eps), inv_c=1.0 / c),
        out_shape=jax.ShapeDtypeStruct((m, c), x.dtype),
        grid=grid,
        in_specs=[
            pl.BlockSpec((tm, c), lambda i: (i, 0)),
            pl.BlockSpec((1, c), lambda i: (0, 0)),
            pl.BlockSpec((1, c), lambda i: (0, 0)),
        ],
        out_specs=pl.BlockSpec((tm, c), lambda i: (i, 0)),
        compiler_params=pltpu.CompilerParams(
            dimension_semantics=("parallel",),
            vmem_limit_bytes=vmem_limit,
        ),
    )(
        xr,
        weight.reshape(1, c).astype(jnp.float32),
        bias.reshape(1, c).astype(jnp.float32),
    )
    return out.reshape(orig_shape)


# ----------------------------------------------------------------------------
# Public API mirroring the PyTorch module's forward()
# ----------------------------------------------------------------------------
def layer_norm(x, weight, bias, eps=1e-6, data_format="channels_last"):
    if data_format == "channels_last":
        return layer_norm_channels_last(x, weight, bias, eps)
    elif data_format == "channels_first":
        return layer_norm_channels_first(x, weight, bias, eps)
    raise NotImplementedError(data_format)


# ----------------------------------------------------------------------------
# Pure-JAX references (for correctness checks)
# ----------------------------------------------------------------------------
def _ref_channels_first(x, w, b, eps):
    u = jnp.mean(x, axis=1, keepdims=True)
    s = jnp.mean((x - u) ** 2, axis=1, keepdims=True)
    xn = (x - u) / jnp.sqrt(s + eps)
    shp = (1, -1) + (1,) * (x.ndim - 2)
    return w.reshape(shp) * xn + b.reshape(shp)


def _ref_channels_last(x, w, b, eps):
    u = jnp.mean(x, axis=-1, keepdims=True)
    s = jnp.mean((x - u) ** 2, axis=-1, keepdims=True)
    return (x - u) / jnp.sqrt(s + eps) * w + b


# ----------------------------------------------------------------------------
if __name__ == "__main__":
    key = jax.random.PRNGKey(0)
    k1, k2, k3, k4, k5, k6 = jax.random.split(key, 6)
    eps = 1e-6

    # channels_first: NCHW tensor, LayerNorm over the channel dim (as used by
    # GEAUNet's group_aggregation_bridge).
    x_cf = jax.random.normal(k1, (2, 4, 16, 16), jnp.float32)
    w_cf = 1.0 + 0.1 * jax.random.normal(k2, (4,), jnp.float32)
    b_cf = 0.1 * jax.random.normal(k3, (4,), jnp.float32)
    cf_fn = jax.jit(functools.partial(layer_norm, eps=eps, data_format="channels_first"))
    y_cf = cf_fn(x_cf, w_cf, b_cf)
    jax.block_until_ready(y_cf)
    assert y_cf.shape == x_cf.shape
    np.testing.assert_allclose(
        np.asarray(y_cf), np.asarray(_ref_channels_first(x_cf, w_cf, b_cf, eps)),
        rtol=1e-4, atol=1e-4)

    cl_fn = jax.jit(functools.partial(layer_norm, eps=eps, data_format="channels_last"))

    # channels_last, small hidden (32): exercises the lane-dense transposed path.
    x_cl = jax.random.normal(k4, (2, 8, 32), jnp.float32)
    w_cl = 1.0 + 0.1 * jax.random.normal(k5, (32,), jnp.float32)
    b_cl = 0.1 * jax.random.normal(k6, (32,), jnp.float32)
    y_cl = cl_fn(x_cl, w_cl, b_cl)
    jax.block_until_ready(y_cl)
    assert y_cl.shape == x_cl.shape
    np.testing.assert_allclose(
        np.asarray(y_cl), np.asarray(_ref_channels_last(x_cl, w_cl, b_cl, eps)),
        rtol=1e-4, atol=1e-4)

    # channels_last, hidden = 128: exercises the direct lane-dense row-wise kernel.
    x_cl2 = jax.random.normal(k1, (2, 8, 128), jnp.float32)
    w_cl2 = jnp.full((128,), 0.9, jnp.float32)
    b_cl2 = jnp.full((128,), 0.05, jnp.float32)
    y_cl2 = cl_fn(x_cl2, w_cl2, b_cl2)
    jax.block_until_ready(y_cl2)
    assert y_cl2.shape == x_cl2.shape
    np.testing.assert_allclose(
        np.asarray(y_cl2), np.asarray(_ref_channels_last(x_cl2, w_cl2, b_cl2, eps)),
        rtol=1e-4, atol=1e-4)

    assert (bool(jnp.all(jnp.isfinite(y_cf)))
            and bool(jnp.all(jnp.isfinite(y_cl)))
            and bool(jnp.all(jnp.isfinite(y_cl2))))
    print("KERNEL_OK")
</pallas_src>

<mosaic_0001>
module attributes {stable_mosaic.version = 11 : i64} {
  func.func @_ln_cf_kernel(%arg0: i32, %arg1: i32, %arg2: memref<1x4x256xf32, #tpu.memory_space<vmem>>, %arg3: memref<4x1xf32, #tpu.memory_space<vmem>>, %arg4: memref<4x1xf32, #tpu.memory_space<vmem>>, %arg5: memref<1x4x256xf32, #tpu.memory_space<vmem>>) attributes {dimension_semantics = [#tpu.dimension_semantics<parallel>, #tpu.dimension_semantics<parallel>], iteration_bounds = array<i64: 2, 1>, scalar_prefetch = 0 : i64, scratch_operands = 0 : i64, tpu.core_type = #tpu.core_type<tc>, window_params = [{transform_indices = @transform_0, window_bounds = array<i64: 1, 4, 256>}, {pipeline_mode = #tpu.pipeline_mode<synchronous>, transform_indices = @transform_1, window_bounds = array<i64: 4, 1>}, {pipeline_mode = #tpu.pipeline_mode<synchronous>, transform_indices = @transform_2, window_bounds = array<i64: 4, 1>}, {transform_indices = @transform_3, window_bounds = array<i64: 1, 4, 256>}]} {
    %c0 = arith.constant 0 : index
    %c0_0 = arith.constant 0 : index
    %c0_1 = arith.constant 0 : index
    %0 = vector.load %arg2[%c0, %c0_0, %c0_1] : memref<1x4x256xf32, #tpu.memory_space<vmem>>, vector<1x4x256xf32>
    %cst = arith.constant dense<0.000000e+00> : vector<1x256xf32>
    %1 = vector.multi_reduction <add>, %0, %cst [1] : vector<1x4x256xf32> to vector<1x256xf32>
    %2 = vector.shape_cast %1 : vector<1x256xf32> to vector<1x1x256xf32>
    %cst_2 = arith.constant 2.500000e-01 : f32
    %3 = vector.broadcast %cst_2 : f32 to vector<1x1x256xf32>
    %4 = arith.mulf %2, %3 : vector<1x1x256xf32>
    %5 = vector.broadcast %4 : vector<1x1x256xf32> to vector<1x4x256xf32>
    %6 = arith.subf %0, %5 : vector<1x4x256xf32>
    %7 = arith.mulf %6, %6 : vector<1x4x256xf32>
    %cst_3 = arith.constant dense<0.000000e+00> : vector<1x256xf32>
    %8 = vector.multi_reduction <add>, %7, %cst_3 [1] : vector<1x4x256xf32> to vector<1x256xf32>
    %9 = vector.shape_cast %8 : vector<1x256xf32> to vector<1x1x256xf32>
    %cst_4 = arith.constant 2.500000e-01 : f32
    %10 = vector.broadcast %cst_4 : f32 to vector<1x1x256xf32>
    %11 = arith.mulf %9, %10 : vector<1x1x256xf32>
    %cst_5 = arith.constant 9.99999997E-7 : f32
    %12 = vector.broadcast %cst_5 : f32 to vector<1x1x256xf32>
    %13 = arith.addf %11, %12 : vector<1x1x256xf32>
    %14 = math.rsqrt %13 : vector<1x1x256xf32>
    %15 = vector.broadcast %14 : vector<1x1x256xf32> to vector<1x4x256xf32>
    %16 = arith.mulf %6, %15 : vector<1x4x256xf32>
    %c0_6 = arith.constant 0 : index
    %c0_7 = arith.constant 0 : index
    %17 = vector.load %arg3[%c0_6, %c0_7] : memref<4x1xf32, #tpu.memory_space<vmem>>, vector<4x1xf32>
    %18 = vector.shape_cast %17 : vector<4x1xf32> to vector<1x4x1xf32>
    %19 = vector.broadcast %18 : vector<1x4x1xf32> to vector<1x4x256xf32>
    %20 = arith.mulf %16, %19 : vector<1x4x256xf32>
    %c0_8 = arith.constant 0 : index
    %c0_9 = arith.constant 0 : index
    %21 = vector.load %arg4[%c0_8, %c0_9] : memref<4x1xf32, #tpu.memory_space<vmem>>, vector<4x1xf32>
    %22 = vector.shape_cast %21 : vector<4x1xf32> to vector<1x4x1xf32>
    %23 = vector.broadcast %22 : vector<1x4x1xf32> to vector<1x4x256xf32>
    %24 = arith.addf %20, %23 : vector<1x4x256xf32>
    %c0_10 = arith.constant 0 : index
    %c0_11 = arith.constant 0 : index
    %c0_12 = arith.constant 0 : index
    %25 = vector.load %arg5[%c0_10, %c0_11, %c0_12] : memref<1x4x256xf32, #tpu.memory_space<vmem>>, vector<1x4x256xf32>
    tpu.vector_store %arg5[%c0_10, %c0_11, %c0_12], %24 {strides = array<i32>} : memref<1x4x256xf32, #tpu.memory_space<vmem>>, vector<1x4x256xf32>,
    return
  }
  func.func @transform_0(%arg0: i32, %arg1: i32) -> (i32, i32, i32) {
    %c0_i32 = arith.constant 0 : i32
    %c0_i32_0 = arith.constant 0 : i32
    return %arg0, %c0_i32, %arg1 : i32, i32, i32
  }
  func.func @transform_1(%arg0: i32, %arg1: i32) -> (i32, i32) {
    %c0_i32 = arith.constant 0 : i32
    %c0_i32_0 = arith.constant 0 : i32
    %c0_i32_1 = arith.constant 0 : i32
    return %c0_i32, %c0_i32_0 : i32, i32
  }
  func.func @transform_2(%arg0: i32, %arg1: i32) -> (i32, i32) {
    %c0_i32 = arith.constant 0 : i32
    %c0_i32_0 = arith.constant 0 : i32
    %c0_i32_1 = arith.constant 0 : i32
    return %c0_i32, %c0_i32_0 : i32, i32
  }
  func.func @transform_3(%arg0: i32, %arg1: i32) -> (i32, i32, i32) {
    %c0_i32 = arith.constant 0 : i32
    %c0_i32_0 = arith.constant 0 : i32
    return %arg0, %c0_i32, %arg1 : i32, i32, i32
  }
}

</mosaic_0001>

<bundles_post_ra>
// kernel: layer_norm.1
= control target key start
LH: loop header
LB: loop body
LE: loop exit
PB: predicated region body
PF: predicated region fallthrough
CT: control target
= control target key end

     0   :  { %s472_s12 = smov 0   ;;  %s474_s13 = smov 0   ;;  %s522_s0 = inlined_call_operand.vmem [shape: f32[2,4,256], index: 0, kind: input, shape index: {}]   ;;  %s523_s1 = inlined_call_operand.vmem [shape: f32[4,1], index: 1, kind: input, shape index: {}]   ;;  %s524_s2 = inlined_call_operand.vmem [shape: f32[4,1], index: 2, kind: input, shape index: {}]   ;;  %s525_s3 = inlined_call_operand.vmem [shape: f32[2,4,256], index: 3, kind: output, shape index: {}]  }
   0x1   :  { %s476_s14 = smov 0  }
   0x2 LB: > { %s25_s15 = sadd.s32 1, %s444_s13  ;;  %p385_p0 = scmp.ge.s32.totalorder %s448_s14, 1  ;;  %s448_s14 = sphi %s476_s14, %s13_s14   ;;  %s444_s13 = sphi %s474_s13, %s527_s13   ;;  %s440_s12 = sphi %s472_s12, %s526_s12  }
   0x3   : > { %p27_p1 = scmp.ge.s32.totalorder %s25_s15, 2  ;;  %p158_p2 = scmp.lt.s32.totalorder %s448_s14, 3 }
   0x5   : > { %s529_s15 = smov (%p27_p1, %s25_s15), 0  ;;  %p159_p3 = pnand %p385_p0, %p158_p2 }
   0x6   : > { %v265_v0 = vld [vmem:[%s523_s1] sm:$0xf] (!%p159_p3)  ;;  %v450_v1 = vmov (!%p159_p3), 0   ;;  %p191_p4 = scmp.lt.s32.totalorder (!%p159_p3), %s440_s12, 1  ;;  %vm214_vm0 = vcmask (!%p159_p3), 1043456   ;;  %v273_v45 = vlaneseq (!%p159_p3) }
   0x7   : > { %162 = sbr.rel (%p159_p3) target bundleno = 145 (0x91), region = 32  ;;  %420 = vset.pattern.permute.xlu0 (!%p159_p3), %v450_v1  ;;  %v279_v2 = vld [vmem:[%s524_s2] sm:$0xf] (!%p159_p3)  ;;  %v451_v43 = vmov (!%p159_p3), 839922192  }
   0x8   : > { %268 = vperm.xlu0 (!%p159_p3), %420, %v265_v0   ;;  %v271_v44 = vunpack.c.l.s4 (!%p159_p3), %v451_v43  ;;  %v274_v48 = vshrl.u32 (!%p159_p3), %v273_v45, 7 }
   0xa   : > { %v272_v47 = vunpack.c.0.s8 (!%p159_p3), %v271_v44 }
   0xc   : > { %282 = vperm.xlu0 (!%p159_p3), %420, %v279_v2   ;;  %v275_v50 = vsub.s32 (!%p159_p3), %v272_v47, %v274_v48 }
   0xe   : > { %s531_s12 = smov (!%p191_p4, %s440_s12), 1 }
   0xf   : > { %s392_s20 = sshll.u32 %s531_s12, 3 }
  0x10   : > { %s198_s23 = scalar_lea.vmem %s522_s0, %s392_s20  ;;  %s208_s26 = scalar_lea.vmem %s525_s3, %s392_s20 }
  0x11   : > { %v210_v3 = vld [vmem:[%s198_s23] sm:$0xff] }
  0x12   : > { %v212_v4 = vcombine.high %v210_v3, %v210_v3  ;;  %v215_v5 = vsel %vm214_vm0, %v210_v3, 0.0 }
  0x13   : > { %v216_v7 = vrot.slane %v215_v5, 4 }
  0x14   : > { %v222_v6 = vsel %vm214_vm0, %v212_v4, 0.0 }
  0x15   : > { %v223_v8 = vrot.slane %v222_v6, 4  ;;  %v217_v9 = vadd.f32 %v216_v7, %v215_v5 }
  0x17   : > { %v224_v10 = vadd.f32 %v223_v8, %v222_v6  ;;  %v218_v11 = vrot.slane %v217_v9, 2 }
  0x19   : > { %v225_v12 = vrot.slane %v224_v10, 2  ;;  %v219_v13 = vadd.f32 %v218_v11, %v217_v9 }
  0x1b   : > { %v226_v14 = vadd.f32 %v225_v12, %v224_v10  ;;  %v220_v15 = vrot.slane %v219_v13, 1 }
  0x1d   : > { %v227_v16 = vrot.slane %v226_v14, 1  ;;  %v221_v17 = vadd.f32 %v220_v15, %v219_v13 }
  0x1f   : > { %v228_v18 = vadd.f32 %v227_v16, %v226_v14  ;;  %v229_v19 = vmul.f32 0.25, %v221_v17 }
  0x21   : > { %v230_v20 = vmul.f32 0.25, %v228_v18 }
  0x23   : > { %v233_v21 = vcombine.low %v229_v19, %v230_v20 }
  0x25   : > { %v235_v22 = vsub.f32 %v210_v3, %v233_v21 }
  0x27   : > { %v236_v23 = vmul.f32 %v235_v22, %v235_v22 }
  0x29   : > { %v238_v24 = vcombine.high %v236_v23, %v236_v23  ;;  %v240_v25 = vsel %vm214_vm0, %v236_v23, 0.0 }
  0x2a   : > { %v241_v27 = vrot.slane %v240_v25, 4 }
  0x2b   : > { %v247_v26 = vsel %vm214_vm0, %v238_v24, 0.0 }
  0x2c   : > { %v248_v28 = vrot.slane %v247_v26, 4  ;;  %v242_v29 = vadd.f32 %v241_v27, %v240_v25 }
  0x2e   : > { %v249_v30 = vadd.f32 %v248_v28, %v247_v26  ;;  %v243_v31 = vrot.slane %v242_v29, 2 }
  0x30   : > { %v250_v32 = vrot.slane %v249_v30, 2  ;;  %v244_v33 = vadd.f32 %v243_v31, %v242_v29 }
  0x32   : > { %v251_v34 = vadd.f32 %v250_v32, %v249_v30  ;;  %v245_v35 = vrot.slane %v244_v33, 1 }
  0x34   : > { %v252_v36 = vrot.slane %v251_v34, 1  ;;  %v246_v37 = vadd.f32 %v245_v35, %v244_v33 }
  0x36   : > { %v253_v38 = vadd.f32 %v252_v36, %v251_v34  ;;  %v254_v39 = vmul.f32 0.25, %v246_v37 }
  0x38   : > { %v255_v40 = vmul.f32 0.25, %v253_v38  ;;  %v256_v41 = vadd.f32 1e-06, %v254_v39 }
  0x3a   : > { %v257_v42 = vadd.f32 1e-06, %v255_v40  ;;  %422 = vrsqrt.f32 %v256_v41 }
  0x3c   : > { %424 = vrsqrt.f32 %v257_v42 }
  0x44   : > { %v423_v46 = vpop.eup %422 }
  0x46   : > { %v425_v49 = vpop.eup %424 }
  0x47   : > { %v262_v51 = vcombine.low %v423_v46, %v425_v49 }
  0x49   : > { %v264_v53 = vmul.f32 %v262_v51, %v235_v22 }
  0x87   : > { %v269_v52 = vpop.permute.xlu0 %268 }
  0x88   : > { %v276_v54 = vrot.slane %v269_v52, %v275_v50 }
  0x8a   : > { %v278_v56 = vmul.f32 %v276_v54, %v264_v53 }
  0x8b   : > { %v283_v55 = vpop.permute.xlu0 %282 }
  0x8c   : > { %v290_v57 = vrot.slane %v283_v55, %v275_v50 }
  0x8e   : > { %v292_v58 = vadd.f32 %v290_v57, %v278_v56 }
  0x90   : > { %293 = vst [vmem:[%s208_s26] sm:$0xff] %v292_v58 }
  0x91 PF: > { %s13_s14 = sadd.s32 1, %s448_s14   ;;  %s526_s12 = smov %s444_s13 }
  0x92   : > { %p10_p5 = scmp.ge.s32.totalorder %s13_s14, 4   ;;  %s527_s13 = smov %s529_s15 }
  0x94   :  { %12 = sbr.rel (!%p10_p5) target bundleno = 2 (0x2), region = 62 }

</bundles_post_ra>
